<compile_context>
chip_gen: v7x
topology: tpu7x:2x2x1
jax: 0.10.0
libtpu: 0.0.40
codegen_flags: <defaults>
</compile_context>

<pallas_src>
import functools
import math
from typing import Dict, List, Optional, Sequence, Tuple

import jax
import jax.numpy as jnp
from jax import lax
from jax.experimental import pallas as pl
from jax.experimental.pallas import tpu as pltpu


def _round_up(x: int, m: int) -> int:
    return ((x + m - 1) // m) * m


def _cdiv(a: int, b: int) -> int:
    return -(-a // b)


def _vmem_capacity_bytes() -> int:
    """Per-core VMEM capacity; conservative 64 MiB (v7x) fallback."""
    try:
        info = pltpu.get_tpu_info()
        cap = int(getattr(info, "vmem_capacity_bytes", 0) or 0)
        if cap > 0:
            return cap
    except Exception:
        pass
    return 64 << 20


# ----------------------------------------------------------------------------
# Kernels
# ----------------------------------------------------------------------------
def _distmult_stream_kernel(rel_ids_ref, src_ref, dst_ref, rel_ref, out_ref):
    """Scores TILE_E pre-gathered edges that all share one relation.

    src/dst blocks arrive in the streaming dtype (bf16 by default); the element
    product stays in that dtype so the MXU sees narrow operands and accumulates
    in f32 via preferred_element_type.  Output is a lane-dense (1, TILE_E) row.
    """
    del rel_ids_ref                                     # only used by index_maps
    prod = src_ref[...] * dst_ref[...]                  # (TILE_E, D), stream dtype
    rel = rel_ref[0].astype(prod.dtype)                 # (1, D)
    out_ref[...] = lax.dot_general(
        rel, prod,
        dimension_numbers=(((1,), (1,)), ((), ())),
        preferred_element_type=jnp.float32)


def _distmult_gather_kernel(rel_ids_ref, src_idx_ref, dst_idx_ref,
                            rel_ref, emb_hbm, out_ref,
                            src_buf, dst_buf, sems, *, tile_e):
    """Fused-gather variant: embeddings stay in HBM (pl.ANY).

    The per-tile src/dst node ids live in SMEM (scalar prefetch); 2*TILE_E
    per-row DMAs gather the embedding rows straight into VMEM scratch (all
    outstanding at once), then the tile is scored on the MXU.  Each grid step
    issues and drains its own DMAs, so the grid axis is safely "parallel".
    """
    del rel_ids_ref
    base = pl.program_id(0) * tile_e

    def _issue(r, carry):
        pltpu.make_async_copy(emb_hbm.at[src_idx_ref[base + r]],
                              src_buf.at[r], sems.at[0]).start()
        pltpu.make_async_copy(emb_hbm.at[dst_idx_ref[base + r]],
                              dst_buf.at[r], sems.at[1]).start()
        return carry

    lax.fori_loop(0, tile_e, _issue, 0)

    def _drain(r, carry):
        # Every issued copy moves exactly one (D,) row; wait once per copy with a
        # descriptor of identical size (row indices are irrelevant to the wait).
        pltpu.make_async_copy(emb_hbm.at[0], src_buf.at[0], sems.at[0]).wait()
        pltpu.make_async_copy(emb_hbm.at[0], dst_buf.at[0], sems.at[1]).wait()
        return carry

    lax.fori_loop(0, tile_e, _drain, 0)

    prod = src_buf[...] * dst_buf[...]                  # (TILE_E, D), stream dtype
    rel = rel_ref[0].astype(prod.dtype)                 # (1, D)
    out_ref[...] = lax.dot_general(
        rel, prod,
        dimension_numbers=(((1,), (1,)), ((), ())),
        preferred_element_type=jnp.float32)


# ----------------------------------------------------------------------------
# Tile / VMEM sizing
# ----------------------------------------------------------------------------
def _choose_tile_e(D: int, stream_isz: int, seg_lens: Sequence[int], *,
                   vmem_capacity: int, buffer_count: int = 2,
                   target_stream_bytes: int = 3 << 20,
                   max_tile: int = 16384) -> int:
    """Edge-tile size sized by streamed bytes/step (~2-4 MiB of src+dst), capped
    by a ~40%-of-VMEM budget that includes the in-kernel product intermediate,
    by a padding-waste bound, and (if needed) shrunk so the grid has >=2 steps."""
    per_edge_stream = 2 * D * stream_isz
    tile = target_stream_bytes // max(per_edge_stream, 1)
    # VMEM: buffer_count-deep src+dst streams + (TILE_E, D) product + out rows.
    per_edge_vmem = (2 * buffer_count + 1) * D * stream_isz + 4 * (buffer_count + 1)
    tile = min(tile, int(0.4 * vmem_capacity) // max(per_edge_vmem, 1))
    # Padding waste: each segment pads by < tile; keep total padding ~<= 25%.
    total = sum(seg_lens)
    tile = min(tile, max(total // (4 * len(seg_lens)), 128))
    tile = min(tile, _round_up(max(seg_lens), 128), max_tile)
    tile = max(128, (tile // 128) * 128)
    # v7x megacore: make sure both TensorCores can get at least one tile.
    while tile > 128 and sum(_cdiv(e, tile) for e in seg_lens) < 2:
        tile = max(128, ((tile // 2) // 128) * 128)
    return int(tile)


def _vmem_limit_bytes(tile_e: int, D: int, stream_isz: int,
                      buffer_count: int, vmem_capacity: int) -> int:
    streams = 2 * buffer_count * tile_e * D * stream_isz    # src+dst buffers
    interm = tile_e * D * stream_isz                        # (TILE_E, D) product
    misc = buffer_count * (4 * tile_e + 4 * D) + (2 << 20)  # out rows, rel, slack
    need = streams + interm + misc + (8 << 20)
    return int(max(16 << 20, min(need, vmem_capacity - (8 << 20))))


# ----------------------------------------------------------------------------
# Batched DistMult scoring (one pallas_call per forward)
# ----------------------------------------------------------------------------
_MAX_PREFETCH_EDGES = 32768   # SMEM budget for scalar-prefetched index arrays


def _distmult_scores_batched(
    embeddings: jnp.ndarray,
    relation_weights: jnp.ndarray,
    segments: Sequence[Tuple[jnp.ndarray, jnp.ndarray, int]],
    *,
    stream_dtype=jnp.bfloat16,
    tile_e: Optional[int] = None,
    buffer_count: int = 2,
    fuse_gather: Optional[bool] = None,
) -> List[jnp.ndarray]:
    """Score all (src_idx, dst_idx, relation_idx) segments with ONE pallas_call."""
    num_rel, D = relation_weights.shape
    sdt = jnp.dtype(embeddings.dtype if stream_dtype is None else stream_dtype)
    isz = sdt.itemsize
    seg_lens = [int(s.shape[0]) for s, _, _ in segments]
    cap = _vmem_capacity_bytes()

    if fuse_gather is None:
        # Per-row DMA gather only pays off for rows >= ~512 B and lane-aligned D.
        fuse_gather = (D % 128 == 0) and (D * isz >= 512)

    if tile_e is None:
        tile_e = _choose_tile_e(D, isz, seg_lens, vmem_capacity=cap,
                                buffer_count=buffer_count,
                                max_tile=2048 if fuse_gather else 16384)
    else:
        tile_e = max(128, (int(tile_e) // 128) * 128)

    # Pad only the int32 index vectors (cheap; index 0 is a valid row) so no tile
    # straddles two relations; gathered float rows are never re-padded in HBM.
    padded_src, padded_dst, tile_rel_ids, seg_bounds = [], [], [], []
    offset = 0
    for (src_idx, dst_idx, rel_idx), e in zip(segments, seg_lens):
        e_pad = max(_round_up(e, tile_e), tile_e)
        pad = e_pad - e
        padded_src.append(jnp.pad(src_idx.astype(jnp.int32), (0, pad)))
        padded_dst.append(jnp.pad(dst_idx.astype(jnp.int32), (0, pad)))
        tile_rel_ids.append(jnp.full((e_pad // tile_e,), rel_idx, dtype=jnp.int32))
        seg_bounds.append((offset, e))
        offset += e_pad
    src_all = jnp.concatenate(padded_src)
    dst_all = jnp.concatenate(padded_dst)
    rel_ids = jnp.concatenate(tile_rel_ids)
    total = offset
    n_tiles = total // tile_e

    if fuse_gather and total > _MAX_PREFETCH_EDGES:
        # TODO(synk): stream index chunks via an SMEM BlockSpec instead of scalar
        # prefetch so the fused-gather path also covers very large edge counts.
        fuse_gather = False

    emb_stream = embeddings.astype(sdt)          # single cast of the node table
    rel3 = relation_weights.reshape(num_rel, 1, D)
    vmem_limit = _vmem_limit_bytes(tile_e, D, isz, buffer_count, cap)
    cparams = pltpu.CompilerParams(dimension_semantics=("parallel",),
                                   vmem_limit_bytes=vmem_limit)
    out_shape = jax.ShapeDtypeStruct((1, total), jnp.float32)

    if fuse_gather:
        out = pl.pallas_call(
            functools.partial(_distmult_gather_kernel, tile_e=tile_e),
            out_shape=out_shape,
            grid_spec=pltpu.PrefetchScalarGridSpec(
                num_scalar_prefetch=3,
                grid=(n_tiles,),
                in_specs=[
                    pl.BlockSpec((1, 1, D), lambda i, rid, s, d: (rid[i], 0, 0)),
                    pl.BlockSpec(memory_space=pl.ANY),      # embeddings stay in HBM
                ],
                out_specs=pl.BlockSpec((1, tile_e), lambda i, rid, s, d: (0, i)),
                scratch_shapes=[
                    pltpu.VMEM((tile_e, D), sdt),           # gathered src rows
                    pltpu.VMEM((tile_e, D), sdt),           # gathered dst rows
                    pltpu.SemaphoreType.DMA((2,)),
                ]),
            compiler_params=cparams,
        )(rel_ids, src_all, dst_all, rel3, emb_stream)
    else:
        # Wrapper-side gather (small rows): gather from the bf16 table so the
        # dominant src+dst HBM stream is halved.
        src_emb = jnp.take(emb_stream, src_all, axis=0)     # (total, D)
        dst_emb = jnp.take(emb_stream, dst_all, axis=0)     # (total, D)
        spec_kwargs = {}
        if buffer_count != 2:
            spec_kwargs = dict(pipeline_mode=pl.Buffered(buffer_count))
        out = pl.pallas_call(
            _distmult_stream_kernel,
            out_shape=out_shape,
            grid_spec=pltpu.PrefetchScalarGridSpec(
                num_scalar_prefetch=1,
                grid=(n_tiles,),
                in_specs=[
                    pl.BlockSpec((tile_e, D), lambda i, rid: (i, 0), **spec_kwargs),
                    pl.BlockSpec((tile_e, D), lambda i, rid: (i, 0), **spec_kwargs),
                    pl.BlockSpec((1, 1, D), lambda i, rid: (rid[i], 0, 0)),
                ],
                out_specs=pl.BlockSpec((1, tile_e), lambda i, rid: (0, i)),
            ),
            compiler_params=cparams,
        )(rel_ids, src_emb, dst_emb, rel3)

    flat = out[0]
    return [flat[off:off + e] for off, e in seg_bounds]


# ----------------------------------------------------------------------------
# Module
# ----------------------------------------------------------------------------
class LinkPredictionHead:
    """JAX/Pallas port of the PyTorch LinkPredictionHead ('distmult' scoring).

    Forward semantics match module.eval(): dropout is the identity.
    """

    def __init__(self,
                 embedding_dim: int,
                 relation_types: List[str],
                 dropout: float = 0.1,
                 score_type: str = "distmult",
                 margin: float = 1.0,
                 *,
                 key: jax.Array,
                 stream_dtype=jnp.bfloat16,
                 tile_e: Optional[int] = None,
                 buffer_count: int = 2,
                 fuse_gather: Optional[bool] = None):
        assert score_type == "distmult", "only the distmult path is implemented"
        self.embedding_dim = embedding_dim
        self.relation_types = list(relation_types)
        self.num_relations = len(self.relation_types)
        self.score_type = score_type
        self.margin = margin
        self.dropout = dropout              # eval-mode (identity) in this forward
        self.stream_dtype = stream_dtype    # HBM streaming dtype (f32 accumulation)
        self.tile_e = tile_e                # None => auto-size
        self.buffer_count = buffer_count    # 3 is worth trying on v7x
        self.fuse_gather = fuse_gather      # None => auto (rows >= 512 B)

        # Xavier-uniform init: bound = sqrt(6 / (fan_in + fan_out))
        fan_out, fan_in = self.num_relations, embedding_dim
        bound = math.sqrt(6.0 / (fan_in + fan_out))
        self.relation_weights = jax.random.uniform(
            key, (self.num_relations, embedding_dim),
            dtype=jnp.float32, minval=-bound, maxval=bound)

    def _score_segments(self, embeddings, segments):
        return _distmult_scores_batched(
            embeddings, self.relation_weights, segments,
            stream_dtype=self.stream_dtype, tile_e=self.tile_e,
            buffer_count=self.buffer_count, fuse_gather=self.fuse_gather)

    def score_edges(self, embeddings, src_indices, dst_indices, relation_idx):
        # relation_idx must be a static Python int (as in the PyTorch API).
        return self._score_segments(
            embeddings, [(src_indices, dst_indices, int(relation_idx))])[0]

    def forward(self,
                embeddings: jnp.ndarray,
                pos_edges: Dict[str, Tuple[jnp.ndarray, jnp.ndarray]],
                neg_edges: Optional[Dict[str, Tuple[jnp.ndarray, jnp.ndarray]]] = None
                ) -> Dict[str, jnp.ndarray]:
        keys, segments = [], []
        for rel_idx, rel_name in enumerate(self.relation_types):
            if rel_name not in pos_edges:
                continue
            src, dst = pos_edges[rel_name]
            keys.append(f"{rel_name}_pos")
            segments.append((src, dst, rel_idx))
            if neg_edges is not None and rel_name in neg_edges:
                src, dst = neg_edges[rel_name]
                keys.append(f"{rel_name}_neg")
                segments.append((src, dst, rel_idx))
        if not segments:
            return {}
        per_seg = self._score_segments(embeddings, segments)
        return dict(zip(keys, per_seg))

    def predict(self, embeddings, src_indices, dst_indices):
        segments = [(src_indices, dst_indices, r) for r in range(self.num_relations)]
        per_seg = self._score_segments(embeddings, segments)
        return dict(zip(self.relation_types, per_seg))

    def loss(self, scores: Dict[str, jnp.ndarray]) -> jnp.ndarray:
        total = 0.0
        num_rels = 0
        for rel_name in self.relation_types:
            pk, nk = f"{rel_name}_pos", f"{rel_name}_neg"
            if pk in scores and nk in scores:
                total = total + jnp.mean(
                    jax.nn.relu(self.margin - scores[pk] + scores[nk]))
                num_rels += 1
        if num_rels > 0:
            return total / num_rels
        return jnp.array(0.0, dtype=jnp.float32)


# ----------------------------------------------------------------------------
# Demo / correctness check
# ----------------------------------------------------------------------------
if __name__ == "__main__":
    def run_case(seed, num_nodes, embedding_dim, relation_types, edge_counts):
        key = jax.random.PRNGKey(seed)
        k_emb, k_param, k_idx = jax.random.split(key, 3)
        head = LinkPredictionHead(embedding_dim, relation_types, key=k_param)
        embeddings = jax.random.normal(k_emb, (num_nodes, embedding_dim),
                                       dtype=jnp.float32)
        ks = iter(jax.random.split(k_idx, 4 * len(relation_types)))
        pos_edges, neg_edges = {}, {}
        for rel, n_e in zip(relation_types, edge_counts):
            pos_edges[rel] = (jax.random.randint(next(ks), (n_e,), 0, num_nodes),
                              jax.random.randint(next(ks), (n_e,), 0, num_nodes))
            neg_edges[rel] = (jax.random.randint(next(ks), (n_e,), 0, num_nodes),
                              jax.random.randint(next(ks), (n_e,), 0, num_nodes))

        scores = head.forward(embeddings, pos_edges, neg_edges)
        for v in scores.values():
            jax.block_until_ready(v)

        # Reference: bf16-streamed embeddings, f32 math.  The kernel additionally
        # rounds the element product and relation row to bf16 before the MXU,
        # hence the tolerance.
        emb_ref = embeddings.astype(jnp.bfloat16).astype(jnp.float32)
        for rel_idx, rel in enumerate(relation_types):
            for tag, edges in (("pos", pos_edges), ("neg", neg_edges)):
                s, d = edges[rel]
                ref = jnp.sum(emb_ref[s] * head.relation_weights[rel_idx]
                              * emb_ref[d], axis=1)
                got = scores[f"{rel}_{tag}"]
                assert got.shape == ref.shape, (rel, tag, got.shape)
                assert jnp.allclose(got, ref, atol=1e-1, rtol=5e-2), (
                    rel, tag, float(jnp.max(jnp.abs(got - ref))))

        loss = head.loss(scores)
        jax.block_until_ready(loss)
        return loss

    # Case 1: module-scale shapes (D=32) -> wrapper-gather bf16 streaming path.
    run_case(0, num_nodes=32, embedding_dim=32,
             relation_types=["interacts", "binds"], edge_counts=[8, 8])

    # Case 2: D=256 (rows >= 512 B in bf16) -> fused in-kernel DMA-gather path,
    # with heterogeneous segment sizes to exercise per-segment padding.
    run_case(1, num_nodes=64, embedding_dim=256,
             relation_types=["interacts", "binds"], edge_counts=[40, 24])

    print("KERNEL_OK")
</pallas_src>

<mosaic_0001>
module attributes {stable_mosaic.version = 11 : i64} {
  func.func @_distmult_stream_kernel(%arg0: i32, %arg1: memref<4xi32, #tpu.memory_space<smem>>, %arg2: memref<128x32xbf16, #tpu.memory_space<vmem>>, %arg3: memref<128x32xbf16, #tpu.memory_space<vmem>>, %arg4: memref<1x1x32xf32, #tpu.memory_space<vmem>>, %arg5: memref<1x128xf32, #tpu.memory_space<vmem>>) attributes {dimension_semantics = [#tpu.dimension_semantics<parallel>], iteration_bounds = array<i64: 4>, scalar_prefetch = 1 : i64, scratch_operands = 0 : i64, tpu.core_type = #tpu.core_type<tc>, window_params = [{transform_indices = @transform_0, window_bounds = array<i64: 128, 32>}, {transform_indices = @transform_1, window_bounds = array<i64: 128, 32>}, {transform_indices = @transform_2, window_bounds = array<i64: 1, 1, 32>}, {transform_indices = @transform_3, window_bounds = array<i64: 1, 128>}]} {
    %c0 = arith.constant 0 : index
    %c0_0 = arith.constant 0 : index
    %0 = vector.load %arg2[%c0, %c0_0] : memref<128x32xbf16, #tpu.memory_space<vmem>>, vector<128x32xbf16>
    %c0_1 = arith.constant 0 : index
    %c0_2 = arith.constant 0 : index
    %1 = vector.load %arg3[%c0_1, %c0_2] : memref<128x32xbf16, #tpu.memory_space<vmem>>, vector<128x32xbf16>
    %2 = arith.mulf %0, %1 : vector<128x32xbf16>
    %c0_3 = arith.constant 0 : index
    %c0_4 = arith.constant 0 : index
    %c0_5 = arith.constant 0 : index
    %3 = vector.load %arg4[%c0_3, %c0_4, %c0_5] : memref<1x1x32xf32, #tpu.memory_space<vmem>>, vector<1x1x32xf32>
    %4 = vector.shape_cast %3 : vector<1x1x32xf32> to vector<1x32xf32>
    %5 = arith.truncf %4 : vector<1x32xf32> to vector<1x32xbf16>
    %cst = arith.constant dense<0.000000e+00> : vector<1x128xf32>
    %6 = tpu.matmul %5, %2, %cst {dimension_numbers = #tpu.dot_dimension_numbers<[1], [1], [0], [0], [0, 0, 1, 0], [], []>} : vector<1x32xbf16>, vector<128x32xbf16>, vector<1x128xf32> -> vector<1x128xf32>
    %c0_6 = arith.constant 0 : index
    %c0_7 = arith.constant 0 : index
    %7 = vector.load %arg5[%c0_6, %c0_7] : memref<1x128xf32, #tpu.memory_space<vmem>>, vector<1x128xf32>
    tpu.vector_store %arg5[%c0_6, %c0_7], %6 {strides = array<i32>} : memref<1x128xf32, #tpu.memory_space<vmem>>, vector<1x128xf32>,
    return
  }
  func.func @transform_0(%arg0: i32, %arg1: memref<4xi32, #tpu.memory_space<smem>>) -> (i32, i32) {
    %c0_i32 = arith.constant 0 : i32
    %c0_i32_0 = arith.constant 0 : i32
    return %arg0, %c0_i32 : i32, i32
  }
  func.func @transform_1(%arg0: i32, %arg1: memref<4xi32, #tpu.memory_space<smem>>) -> (i32, i32) {
    %c0_i32 = arith.constant 0 : i32
    %c0_i32_0 = arith.constant 0 : i32
    return %arg0, %c0_i32 : i32, i32
  }
  func.func @transform_2(%arg0: i32, %arg1: memref<4xi32, #tpu.memory_space<smem>>) -> (i32, i32, i32) {
    %0 = arith.index_cast %arg0 : i32 to index
    %1 = memref.load %arg1[%0] : memref<4xi32, #tpu.memory_space<smem>>
    %c0_i32 = arith.constant 0 : i32
    %c0_i32_0 = arith.constant 0 : i32
    %c0_i32_1 = arith.constant 0 : i32
    return %1, %c0_i32, %c0_i32_0 : i32, i32, i32
  }
  func.func @transform_3(%arg0: i32, %arg1: memref<4xi32, #tpu.memory_space<smem>>) -> (i32, i32) {
    %c0_i32 = arith.constant 0 : i32
    %c0_i32_0 = arith.constant 0 : i32
    return %c0_i32, %arg0 : i32, i32
  }
}

</mosaic_0001>

<bundles_post_ra>
// kernel: tpu_custom_call.1
= control target key start
LH: loop header
LB: loop body
LE: loop exit
PB: predicated region body
PF: predicated region fallthrough
CT: control target
= control target key end

     0   :  { %s834_s0 = inlined_call_operand.vmem [shape: s32[4], index: 0, kind: input, shape index: {}]   ;;  %s835_s1 = inlined_call_operand.vmem [shape: bf16[512,32], index: 1, kind: input, shape index: {}]   ;;  %s836_s2 = inlined_call_operand.vmem [shape: bf16[512,32], index: 2, kind: input, shape index: {}]   ;;  %s837_s3 = inlined_call_operand.vmem [shape: f32[2,1,32], index: 3, kind: input, shape index: {}]   ;;  %s838_s4 = inlined_call_operand.hbm [shape: f32[1,512], index: 4, kind: output, shape index: {}]  }
   0x1   :  { %s9_s17 = sshll.u32 %s834_s0, 4  ;;  %s10_s17 = int_to_ptr.vmem [resolvable:$true] %s9_s17 }
   0x2   :  { %s560_s18 = scalar_lea.vmem %s10_s17, 16  ;;  %p565_p1 = scmp.lt.s32.totalorder %s10_s17, %s10_s17 }
   0x3   :  { %p561_p0 = scmp.ne.s32.totalorder %s10_s17, %s560_s18  ;;  %p566_p2 = scmp.lt.s32.totalorder %s560_s18, %s560_s18 }
   0x5   :  { %p567_p3 = por %p566_p2, %p565_p1 }
   0x7   :  { %p568_p4 = pnand %p567_p3, %p561_p0 }
   0x9   :  { %571 = shalt.err (!%p568_p4)  }
   0xa   :  { %s638_s19 = smov [#allocation3]  }
   0xb   :  { %12 = dma.vmem_to_smem %s10_s17, 16, %s638_s19, [#allocation2] }
   0xc   :  { %616 = dma.done.wait [#allocation2], 16 }
   0xd   :  { %617 = vsyncadd [#allocation2], 4294967280 }
   0xe   :  { %14 = sfence }
   0xf   :  { %15 = vsyncpa [#allocation5], 0 }
  0x10   :  { %17 = vsyncpa [#allocation5 + $0x1], 0  ;;  %s670_s20 = smov 0   ;;  %s672_s21 = smov 0  }
  0x11   :  { %s674_s0 = smov 0   ;;  %s676_s22 = smov 0  }
  0x12 LB: > { %s691_s23 = sadd.s32 4294967295, %s636_s22   ;;  %s469_s24 = sadd.s32 4294967294, %s636_s22   ;;  %s636_s22 = sphi %s676_s22, %s844_s22   ;;  %s632_s0 = sphi %s674_s0, %s843_s0   ;;  %s628_s21 = sphi %s672_s21, %s842_s21   ;;  %s624_s20 = sphi %s670_s20, %s841_s20  }
  0x13   : > { %s695_s25 = sadd.s32 1, %s636_s22   ;;  %s110_s26 = sadd.s32 1, %s632_s0 }
  0x14   : > { %s107_s27 = ssub.s32 %s636_s22, %s695_s25  ;;  %p120_p5 = scmp.ne.s32.totalorder %s632_s0, %s628_s21 }
  0x15   : > { %p108_p6 = scmp.eq.s32.totalorder %s107_s27, 0  ;;  %p121_p7 = scmp.eq.s32.totalorder %s691_s23, 3 }
  0x16   : > { %p126_p8 = scmp.ne.s32.totalorder %s628_s21, %s624_s20  ;;  %p127_p9 = scmp.eq.s32.totalorder %s469_s24, 3 }
  0x17   : > { %s706_s28 = scalar_select %p108_p6, %s632_s0, %s110_s26  }
  0x18   : > { %p708_p10 = por %p121_p7, %p120_p5  ;;  %p712_p11 = por %p127_p9, %p126_p8 }
  0x19   : > { %p472_p12 = scmp.ge.s32.totalorder %s636_s22, 1  ;;  %p171_p13 = scmp.lt.s32.totalorder %s636_s22, 5 }
  0x1b   : > { %p172_p0 = pnand %p472_p12, %p171_p13 }
  0x1c   : > { %s719_s5 = sshll.u32 (!%p172_p0), %s691_s23, 4  ;;  %v639_v0 = vmov (!%p172_p0), 0.0   ;;  %vm640_vm0 = vmmov (!%p172_p0), 0   ;;  %vm311_vm1 = vcmask (!%p172_p0), 261120   ;;  %s215_s14 = sld [smem:[#allocation3 + %s691_s23]] (!%p172_p0) }
  0x1d   : > { %175 = sbr.rel (%p172_p0) target bundleno = 337 (0x151), region = 32  ;;  %498 = vmatprep.subr.bf16.mxu0 (!%p172_p0), %v639_v0  ;;  %p204_p1 = scmp.lt.s32.totalorder (!%p172_p0), %s719_s5, 63  ;;  %514 = vmatprep.mubr.msk.bf16.mxu0 (!%p172_p0), %vm640_vm0, %v639_v0 }
  0x1e   : > { %s201_s18 = sand.u32 (!%p172_p0), 1, %s628_s21   ;;  %s794_s27 = scalar_lea.hbm (!%p172_p0), %s838_s4, %s719_s5 }
  0x1f   : > { %s202_s19 = scalar_lea.vmem (!%p172_p0), [#allocation4], %s201_s18  ;;  %s641_s8 = smov (!%p172_p0), [#allocation4]  }
  0x20   : > { %s393_s23 = sshll.u32 (!%p172_p0), %s202_s19, 4  ;;  %s576_s9 = sshll.u32 (!%p172_p0), %s641_s8, 4  ;;  %s788_s23 = int_to_ptr.vmem [resolvable:$true] %s393_s23  ;;  %s577_s9 = int_to_ptr.vmem [resolvable:$false] %s576_s9 }
  0x21   : > { %p579_p6 = scmp.lt.s32.totalorder (!%p172_p0), %s788_s23, %s577_s9 }
  0x22   : > { %p216_p2 = scmp.lt.s32.totalorder (!%p172_p0), %s215_s14, 1 }
  0x24   : > { %s205_s6 = scalar_select %p204_p1, %s719_s5, 63 }
  0x25   : > { %s846_s14 = smov (!%p216_p2, %s215_s14), 1 }
  0x26   : > { %s474_s7 = sshll.u32 %s205_s6, 2  ;;  %s218_s17 = scalar_lea.vmem %s837_s3, %s846_s14 }
  0x27   : > { %s728_s10 = scalar_lea.vmem %s835_s1, %s474_s7  ;;  %s733_s13 = scalar_lea.vmem %s836_s2, %s474_s7 }
  0x28   : > { %v221_v1 = vld [vmem:[%s728_s10] sm:$0xf]  ;;  %v222_v2 = vld [vmem:[%s728_s10 + $0x4] sm:$0xf]  ;;  %v223_v6 = vld [vmem:[%s728_s10 + $0x8] sm:$0xf] }
  0x29   : > { %v237_v3 = vld [vmem:[%s733_s13] sm:$0xf]  ;;  %v238_v4 = vld [vmem:[%s733_s13 + $0x4] sm:$0xf]  ;;  %v224_v7 = vld [vmem:[%s728_s10 + $0xc] sm:$0xf] }
  0x2a   : > { %v253_v5 = vmul.bf16 %v237_v3, %v221_v1  ;;  %v254_v8 = vmul.bf16 %v238_v4, %v222_v2  ;;  %v239_v9 = vld [vmem:[%s733_s13 + $0x8] sm:$0xf]  ;;  %v240_v10 = vld [vmem:[%s733_s13 + $0xc] sm:$0xf]  ;;  %v225_v16 = vld [vmem:[%s728_s10 + $0x10] sm:$0xf] }
  0x2b   : > { %v255_v12 = vmul.bf16 %v239_v9, %v223_v6  ;;  %v256_v13 = vmul.bf16 %v240_v10, %v224_v7  ;;  %v226_v17 = vld [vmem:[%s728_s10 + $0x14] sm:$0xf]  ;;  %v241_v18 = vld [vmem:[%s733_s13 + $0x10] sm:$0xf]  ;;  %v227_v24 = vld [vmem:[%s728_s10 + $0x18] sm:$0xf] }
  0x2c   : > { %v477_v11 = vcombine.low %v253_v5, %v254_v8  ;;  %v242_v19 = vld [vmem:[%s733_s13 + $0x14] sm:$0xf]  ;;  %v257_v21 = vmul.bf16 %v241_v18, %v225_v16  ;;  %v228_v25 = vld [vmem:[%s728_s10 + $0x1c] sm:$0xf]  ;;  %v243_v26 = vld [vmem:[%s733_s13 + $0x18] sm:$0xf] }
  0x2d   : > { %v478_v15 = vcombine.low %v255_v12, %v256_v13  ;;  %v258_v22 = vmul.bf16 %v242_v19, %v226_v17  ;;  %v244_v27 = vld [vmem:[%s733_s13 + $0x1c] sm:$0xf]  ;;  %v259_v29 = vmul.bf16 %v243_v26, %v227_v24  ;;  %v229_v32 = vld [vmem:[%s728_s10 + $0x20] sm:$0xf]  ;;  %v230_v33 = vld [vmem:[%s728_s10 + $0x24] sm:$0xf] }
  0x2e   : > { %v316_v14 = vsel %vm311_vm1, %v477_v11, 0  ;;  %v260_v30 = vmul.bf16 %v244_v27, %v228_v25  ;;  %v245_v34 = vld [vmem:[%s733_s13 + $0x20] sm:$0xf]  ;;  %v246_v35 = vld [vmem:[%s733_s13 + $0x24] sm:$0xf]  ;;  %s381_s6 = scalar_lea.sflag [#allocation5], %s201_s18 }
  0x2f   : > { %499 = vmatpush3.bf16.xpose.msra.mxu0 %v316_v14  ;;  %v319_v20 = vsel %vm311_vm1, %v478_v15, 0  ;;  %v479_v23 = vcombine.low %v257_v21, %v258_v22  ;;  %v261_v37 = vmul.bf16 %v245_v34, %v229_v32  ;;  %v262_v38 = vmul.bf16 %v246_v35, %v230_v33  ;;  %v231_v40 = vld [vmem:[%s728_s10 + $0x28] sm:$0xf]  ;;  %v232_v41 = vld [vmem:[%s728_s10 + $0x2c] sm:$0xf]  ;;  %s572_s7 = scalar_lea.vmem %s788_s23, 16 }
  0x30   : > { %500 = vmatprep.subr.bf16.mxu0 %v639_v0  ;;  %v480_v31 = vcombine.low %v259_v29, %v260_v30  ;;  %v247_v42 = vld [vmem:[%s733_s13 + $0x28] sm:$0xf]  ;;  %v248_v43 = vld [vmem:[%s733_s13 + $0x2c] sm:$0xf]  ;;  %v233_v48 = vld [vmem:[%s728_s10 + $0x30] sm:$0xf]  ;;  %p573_p3 = scmp.ne.s32.totalorder %s788_s23, %s572_s7 }
  0x31   : > { %v322_v28 = vsel %vm311_vm1, %v479_v23, 0  ;;  %v481_v39 = vcombine.low %v261_v37, %v262_v38  ;;  %v263_v45 = vmul.bf16 %v247_v42, %v231_v40  ;;  %v264_v46 = vmul.bf16 %v248_v43, %v232_v41  ;;  %v234_v49 = vld [vmem:[%s728_s10 + $0x34] sm:$0xf]  ;;  %v249_v50 = vld [vmem:[%s733_s13 + $0x30] sm:$0xf] }
  0x32   : > { %v325_v36 = vsel %vm311_vm1, %v480_v31, 0  ;;  %v250_v51 = vld [vmem:[%s733_s13 + $0x34] sm:$0xf]  ;;  %v265_v53 = vmul.bf16 %v249_v50, %v233_v48  ;;  %v235_v56 = vld [vmem:[%s728_s10 + $0x38] sm:$0xf]  ;;  %p574_p4 = pnand %p573_p3, %p708_p10 }
  0x33   : > { %v328_v44 = vsel %vm311_vm1, %v481_v39, 0  ;;  %v482_v47 = vcombine.low %v263_v45, %v264_v46  ;;  %v266_v54 = vmul.bf16 %v250_v51, %v234_v49  ;;  %v236_v57 = vld [vmem:[%s728_s10 + $0x3c] sm:$0xf]  ;;  %v251_v58 = vld [vmem:[%s733_s13 + $0x38] sm:$0xf]  ;;  %s578_s10 = scalar_lea.vmem %s577_s9, 32 }
  0x34   : > { %v252_v59 = vld [vmem:[%s733_s13 + $0x3c] sm:$0xf]  ;;  %v267_v61 = vmul.bf16 %v251_v58, %v235_v56  ;;  %v269_v2 = vld [vmem:[%s218_s17] sm:$0x1]  ;;  %p575_p5 = pneg %p574_p4  ;;  %p580_p7 = scmp.lt.s32.totalorder %s578_s10, %s572_s7 }
  0x35   : > { %v331_v52 = vsel %vm311_vm1, %v482_v47, 0  ;;  %v483_v55 = vcombine.low %v265_v53, %v266_v54  ;;  %v268_v62 = vmul.bf16 %v252_v59, %v236_v57  ;;  %v270_v3 = vpack.c.bf16 %v269_v2, %v269_v2 }
  0x36   : > { %p581_p8 = por %p580_p7, %p579_p6 }
  0x37   : > { %501 = vmatpush3.bf16.xpose.msra.mxu0 %v319_v20  ;;  %v334_v60 = vsel %vm311_vm1, %v483_v55, 0  ;;  %v484_v63 = vcombine.low %v267_v61, %v268_v62 }
  0x38   : > { %502 = vmatprep.subr.bf16.mxu0 %v639_v0  ;;  %p582_p9 = pnand %p581_p8, %p575_p5 }
  0x39   : > { %v337_v1 = vsel %vm311_vm1, %v484_v63, 0 }
  0x3f   : > { %503 = vmatpush3.bf16.xpose.msra.mxu0 %v322_v28 }
  0x40   : > { %504 = vmatprep.subr.bf16.mxu0 %v639_v0 }
  0x47   : > { %505 = vmatpush3.bf16.xpose.msra.mxu0 %v325_v36 }
  0x48   : > { %506 = vmatprep.subr.bf16.mxu0 %v639_v0 }
  0x4f   : > { %507 = vmatpush3.bf16.xpose.msra.mxu0 %v328_v44 }
  0x50   : > { %508 = vmatprep.subr.bf16.mxu0 %v639_v0 }
  0x57   : > { %509 = vmatpush3.bf16.xpose.msra.mxu0 %v331_v52 }
  0x58   : > { %510 = vmatprep.subr.bf16.mxu0 %v639_v0 }
  0x5f   : > { %511 = vmatpush3.bf16.xpose.msra.mxu0 %v334_v60 }
  0x60   : > { %512 = vmatprep.subr.bf16.mxu0 %v639_v0 }
  0x67   : > { %513 = vmatpush3.bf16.xpose.msra.mxu0 %v337_v1 }
  0x6e   : > { %515 = vmatmul.mubr.msk.bf16.vlgmr.msra.gmra.mrb[0].mxu0 %vm311_vm1, %v270_v3 }
 0x141   : > { %v373_v0 = vpop.f32.mrb[0].mxu0 }
 0x142   : > { %379 = vst [vmem:[%s202_s19] sm:$0x1] %v373_v0  ;;  %v516_v4 = vpop.f32.mrb[1].mxu0 }
 0x143   : > { %v376_v5 = vpop.f32.mrb[2].mxu0 }
 0x144   : > { %585 = shalt.err (!%p582_p9)
}
 0x145   : > { %s586_s5 = scalar_lea.hbm %s794_s27, 16  ;;  %s590_s13 = scalar_lea.hbm %s838_s4, 64 }
 0x146   : > { %p587_p12 = scmp.ne.s32.totalorder %s794_s27, %s586_s5  ;;  %p591_p1 = scmp.lt.u32.totalorder %s794_s27, %s838_s4 }
 0x147   : > { %p592_p2 = scmp.lt.u32.totalorder %s590_s13, %s586_s5  ;;  %p594_p4 = scmp.lt.u32.totalorder %s586_s5, %s794_s27 }
 0x148   : > { %p588_p13 = pnand %p587_p12, %p708_p10 }
 0x149   : > { %p593_p3 = por %p592_p2, %p591_p1 }
 0x14a   : > { %p589_p0 = pneg %p588_p13 }
 0x14b   : > { %p595_p5 = por %p594_p4, %p593_p3 }
 0x14d   : > { %p596_p6 = pnand %p595_p5, %p589_p0 }
 0x14f   : > { %599 = shalt.err (!%p596_p6)
}
 0x150   : > { %518 = dma.vmem_to_hbm [thread:$0]  (%p708_p10), %s788_s23, 16, %s794_s27, %s381_s6   ;;  %v517_v6 = vpop.f32.mrb[3].mxu0 }
 0x151 PF: > { %p524_p7 = scmp.ge.s32.totalorder %s636_s22, 2  ;;  %s405_s16 = sand.u32 1, %s624_s20  }
 0x152   : > { %s406_s17 = scalar_lea.sflag [#allocation5], %s405_s16 }
 0x153   : > { %p521_p8 = pnand %p524_p7, %p712_p11 }
 0x155   : > { %619 = dma.done.wait (!%p521_p8), %s406_s17, 16  }
 0x156   : > { %621 = vsyncadd (!%p521_p8), %s406_s17, 4294967280  ;;  %p20_p9 = scmp.ge.s32.totalorder %s695_s25, 6   ;;  %s841_s20 = smov %s628_s21 }
 0x157   : > { %s842_s21 = smov %s632_s0  ;;  %s843_s0 = smov %s706_s28 }
 0x158   : > { %s844_s22 = smov %s695_s25  ;;  %22 = sbr.rel (!%p20_p9) target bundleno = 18 (0x12), region = 73 }
 0x15f   :  { %410 = vsyncpa [#allocation5], 1 }
 0x160   :  { %412 = vsyncpa [#allocation5 + $0x1], 1 }

</bundles_post_ra>
